<compile_context>
chip_gen: v6e
topology: v6e:2x2x1
jax: 0.10.0
libtpu: 0.0.40
codegen_flags: <defaults>
</compile_context>

<pallas_src>
import math

import jax
import jax.numpy as jnp
from jax import lax
from jax.experimental import pallas as pl
from jax.experimental.pallas import tpu as pltpu

HIDDEN = 32                      # hidden_size
GMM_COMP = 5                     # gmm_comp_num
GMM_PARAM = 6                    # gmm_param_num
OUT_GMM = GMM_COMP * GMM_PARAM   # 30
GMM_LANES = 32                   # 30 gmm columns + 2 zero-pad -> tidy 32-lane slab
FUSED_OUT = HIDDEN + GMM_LANES   # 64 fused-matmul output columns
RHO_CLAMP = 0.95
TN_MAX = 4096                    # row tile (multiple of 8/128); see VMEM note below


def _round_up(a, m):
    return (a + m - 1) // m * m


def pdf_decoder_kernel(x_ref, w_ref, b_ref, h_ref, gmm_ref, sxy_ref, pdf_ref):
    """One row tile: x (TN, 32) -> h, xy_gmm, sample_xy, xy_pdf (all natural layout)."""
    K = GMM_COMP

    # Single fused MXU pass in natural (rows, features) layout:
    #   y = x @ [W1 | W1@W2 | 0] + [b1 | b1@W2+b2 | 0]        -> (TN, 64)
    y = jnp.dot(x_ref[...], w_ref[...],
                preferred_element_type=jnp.float32) + b_ref[...]

    # Natural-layout stores straight from the matmul output (no plumbing).
    h_ref[...] = y[:, :HIDDEN]                        # output_Layer activation
    gmm_ref[...] = y[:, HIDDEN:HIDDEN + OUT_GMM]      # raw xy_gmm (30 cols)

    # Head math runs lane-dense: one in-kernel XLU transpose of the 32 GMM
    # columns; the N rows stay on the 128-wide lane axis for every VPU/EUP op.
    gT = y[:, HIDDEN:HIDDEN + GMM_LANES].T            # (32, TN), rows 30..31 == 0

    pi_raw = gT[0 * K:1 * K, :]
    u_x    = gT[1 * K:2 * K, :]
    u_y    = gT[2 * K:3 * K, :]
    inv_sx = jnp.exp(-gT[3 * K:4 * K, :])             # 1 / sigma_x
    inv_sy = jnp.exp(-gT[4 * K:5 * K, :])             # 1 / sigma_y
    rho    = jnp.clip(jnp.tanh(gT[5 * K:6 * K, :]), -RHO_CLAMP, RHO_CLAMP)

    # softmax over the K mixture components (sublane axis; lanes stay dense).
    m = jnp.max(pi_raw, axis=0, keepdims=True)                         # (1, TN)
    e = jnp.exp(pi_raw - m)
    pi = e * pl.reciprocal(jnp.sum(e, axis=0, keepdims=True), approx=True)

    # Greedy component selection = first argmax (== torch argmax fallback).
    # adjust_temp is per-row monotone and its value is never returned, so it
    # cannot change the argmax -> removed (also removes global reductions).
    comp = lax.broadcasted_iota(jnp.int32, pi_raw.shape, 0)             # (K, TN)
    idx = jnp.min(jnp.where(pi_raw >= m, comp, K), axis=0, keepdims=True)
    onehot = (comp == idx).astype(jnp.float32)
    sel_ux = jnp.sum(u_x * onehot, axis=0, keepdims=True)               # (1, TN)
    sel_uy = jnp.sum(u_y * onehot, axis=0, keepdims=True)               # (1, TN)

    # batch_pdf (X_Softmax branch) in reciprocal form: no sqrt, no divides.
    zx = (sel_ux - u_x) * inv_sx
    zy = (sel_uy - u_y) * inv_sy
    z = zx * zx + zy * zy - 2.0 * rho * (zx * zy)
    r = lax.rsqrt(1.0 - rho * rho)                    # 1 / sqrt(1 - rho^2)
    a = -z * (0.5 * (r * r))
    # 1 / clamp(2*pi*sx*sy*sqrt(1-rho^2), min=1e-5)  ==  min(..., 1e5)
    inv_norm = jnp.minimum((0.5 / math.pi) * inv_sx * inv_sy * r, 1e5)
    raw_pdf = jnp.sum(pi * jnp.exp(a) * inv_norm, axis=0, keepdims=True)  # (1, TN)

    # Small per-row outputs: one tile-friendly (8, TN) -> (TN, 8) transpose,
    # then exact-shape stores (no wrapper slicing needed afterwards).
    packed = jnp.concatenate(
        [sel_ux, sel_uy, raw_pdf, jnp.zeros_like(pi_raw)], axis=0).T    # (TN, 8)
    sxy_ref[...] = packed[:, :2]
    pdf_ref[...] = packed[:, 2:3]


def pdf_decoder_forward(encoder_output, params):
    """Returns (box_predictor_input, None, sample_xy, None, xy_gmm, xy_pdf)."""
    B, L, H = encoder_output.shape
    assert H == HIDDEN
    N = B * L
    f32 = jnp.float32
    w1, b1, w2, b2 = [p.astype(f32) for p in params]   # weights stored (in, out)

    # Fuse output_Layer and xy_bivariate: g = x@(W1@W2) + (b1@W2 + b2).
    w12 = w1 @ w2                                       # (H, 30)
    b12 = b1 @ w2 + b2                                  # (30,)
    pad = FUSED_OUT - HIDDEN - OUT_GMM                  # 2 zero columns
    w_fused = jnp.concatenate([w1, w12, jnp.zeros((H, pad), f32)], axis=1)
    b_fused = jnp.concatenate([b1, b12, jnp.zeros((pad,), f32)]).reshape(1, FUSED_OUT)

    # Natural row-major activations: reshape is free; NO transpose/pad HBM pass.
    x = encoder_output.reshape(N, H).astype(f32)

    # Row tile.  Natural-layout blocks have <=32 lanes and pad to 128 lanes in
    # VMEM (4x), so the live set is ~5 blocks * 512*TN B * 2 buffers plus
    # ~6*512*TN B of temporaries  ->  ~26 MiB at TN=4096: fits every generation
    # (v7x physical VMEM = 64 MiB) while keeping per-step DMA ~1.5 MB so the
    # ~0.35us pipeline overhead is well amortized.
    TN = min(TN_MAX, _round_up(max(N, 1), 8))
    grid = (pl.cdiv(N, TN),)

    out_shapes = (
        jax.ShapeDtypeStruct((N, HIDDEN), f32),     # box_predictor_input
        jax.ShapeDtypeStruct((N, OUT_GMM), f32),    # xy_gmm (raw linear output)
        jax.ShapeDtypeStruct((N, 2), f32),          # sample_xy
        jax.ShapeDtypeStruct((N, 1), f32),          # xy_pdf
    )
    cost = pl.CostEstimate(
        flops=2 * N * HIDDEN * FUSED_OUT,
        transcendentals=7 * GMM_COMP * N,
        bytes_accessed=4 * (N * (HIDDEN + HIDDEN + OUT_GMM + 2 + 1)
                            + HIDDEN * FUSED_OUT + FUSED_OUT),
    )

    h_out, gmm_out, sxy_out, pdf_out = pl.pallas_call(
        pdf_decoder_kernel,
        out_shape=out_shapes,
        grid=grid,
        in_specs=[
            pl.BlockSpec((TN, HIDDEN), lambda i: (i, 0)),         # activations, tiled
            pl.BlockSpec((HIDDEN, FUSED_OUT), lambda i: (0, 0)),  # fused weight, resident
            pl.BlockSpec((1, FUSED_OUT), lambda i: (0, 0)),       # fused bias, resident
        ],
        out_specs=(
            pl.BlockSpec((TN, HIDDEN), lambda i: (i, 0)),
            pl.BlockSpec((TN, OUT_GMM), lambda i: (i, 0)),
            pl.BlockSpec((TN, 2), lambda i: (i, 0)),
            pl.BlockSpec((TN, 1), lambda i: (i, 0)),
        ),
        compiler_params=pltpu.CompilerParams(
            dimension_semantics=("parallel",),      # shard row tiles over TCs
            vmem_limit_bytes=48 * 1024 * 1024),
        cost_estimate=cost,
    )(x, w_fused, b_fused)

    # Only free reshapes remain (row-major relabels, no HBM passes).
    bpi = h_out.reshape(B, L, HIDDEN)
    xy_gmm = gmm_out.reshape(B, L, OUT_GMM)
    sample_xy = sxy_out.reshape(B, L, 2)
    xy_pdf = pdf_out.reshape(B, L)
    return (bpi, None, sample_xy, None, xy_gmm, xy_pdf)


# ----------------------------- pure-JAX references -----------------------------
def _reference_linears(x, params):
    w1, b1, w2, b2 = [p.astype(jnp.float32) for p in params]
    h = x.astype(jnp.float32) @ w1 + b1
    g = h @ w2 + b2
    return h, g


def _reference_head(gmm_flat):
    """sample_box (greedy, argmax fallback) + batch_pdf, given xy_gmm rows."""
    K = GMM_COMP
    pi_raw = gmm_flat[:, 0 * K:1 * K]
    u_x = gmm_flat[:, 1 * K:2 * K]
    u_y = gmm_flat[:, 2 * K:3 * K]
    sigma_x = jnp.exp(gmm_flat[:, 3 * K:4 * K])
    sigma_y = jnp.exp(gmm_flat[:, 4 * K:5 * K])
    rho = jnp.clip(jnp.tanh(gmm_flat[:, 5 * K:6 * K]), -RHO_CLAMP, RHO_CLAMP)
    pi = jax.nn.softmax(pi_raw, axis=-1)
    idx = jnp.argmax(pi_raw, axis=-1)[:, None]
    sel_x = jnp.take_along_axis(u_x, idx, axis=1)
    sel_y = jnp.take_along_axis(u_y, idx, axis=1)
    dx, dy = sel_x - u_x, sel_y - u_y
    z = ((dx / sigma_x) ** 2 + (dy / sigma_y) ** 2
         - 2.0 * rho * dx * dy / (sigma_x * sigma_y))
    a = -z / (2.0 * (1.0 - rho ** 2))
    norm = jnp.maximum(
        2.0 * math.pi * sigma_x * sigma_y * jnp.sqrt(1.0 - rho ** 2), 1e-5)
    pdf = jnp.sum(pi * jnp.exp(a) / norm, axis=-1)
    return jnp.concatenate([sel_x, sel_y], axis=-1), pdf


if __name__ == "__main__":
    B, L, H = 2, 8, HIDDEN
    key = jax.random.PRNGKey(0)
    k_enc, k_w1, k_b1, k_w2, k_b2 = jax.random.split(key, 5)

    encoder_output = jax.random.normal(k_enc, (B, L, H), jnp.float32)

    # nn.Linear default init: U(-1/sqrt(fan_in), 1/sqrt(fan_in)); stored (in, out).
    bound = 1.0 / math.sqrt(H)
    w1 = jax.random.uniform(k_w1, (H, H), jnp.float32, -bound, bound)
    b1 = jax.random.uniform(k_b1, (H,), jnp.float32, -bound, bound)
    w2 = jax.random.uniform(k_w2, (H, OUT_GMM), jnp.float32, -bound, bound)
    b2 = jax.random.uniform(k_b2, (OUT_GMM,), jnp.float32, -bound, bound)
    params = (w1, b1, w2, b2)

    outs = pdf_decoder_forward(encoder_output, params)
    jax.block_until_ready(outs)

    bpi, _, sample_xy, _, xy_gmm, xy_pdf = outs
    assert bpi.shape == (B, L, H)
    assert sample_xy.shape == (B, L, 2)
    assert xy_gmm.shape == (B, L, OUT_GMM)
    assert xy_pdf.shape == (B, L)
    assert all(bool(jnp.all(jnp.isfinite(t)))
               for t in (bpi, sample_xy, xy_gmm, xy_pdf))

    # Linear outputs vs. a plain-JAX two-step reference (fused path is fp-close).
    h_ref, g_ref = _reference_linears(encoder_output, params)
    assert jnp.allclose(bpi, h_ref, rtol=5e-2, atol=5e-2)
    assert jnp.allclose(xy_gmm, g_ref, rtol=5e-2, atol=5e-2)
    # Head math checked on the kernel's own gmm output (same argmax input), so
    # the comparison is insensitive to matmul-precision-induced tie flips.
    sxy_ref, pdf_ref = _reference_head(xy_gmm.reshape(B * L, OUT_GMM))
    assert jnp.allclose(sample_xy.reshape(B * L, 2), sxy_ref, atol=1e-5)
    assert jnp.allclose(xy_pdf.reshape(B * L), pdf_ref, rtol=5e-2, atol=1e-4)

    print("KERNEL_OK")
</pallas_src>

<mosaic_0001>
module attributes {stable_mosaic.version = 11 : i64} {
  func.func @pdf_decoder_kernel(%arg0: i32, %arg1: memref<16x32xf32, #tpu.memory_space<vmem>>, %arg2: memref<32x64xf32, #tpu.memory_space<vmem>>, %arg3: memref<1x64xf32, #tpu.memory_space<vmem>>, %arg4: memref<16x32xf32, #tpu.memory_space<vmem>>, %arg5: memref<16x30xf32, #tpu.memory_space<vmem>>, %arg6: memref<16x2xf32, #tpu.memory_space<vmem>>, %arg7: memref<16x1xf32, #tpu.memory_space<vmem>>) attributes {dimension_semantics = [#tpu.dimension_semantics<parallel>], iteration_bounds = array<i64: 1>, scalar_prefetch = 0 : i64, scratch_operands = 0 : i64, tpu.core_type = #tpu.core_type<tc>, window_params = [{transform_indices = @transform_0, window_bounds = array<i64: 16, 32>}, {pipeline_mode = #tpu.pipeline_mode<synchronous>, transform_indices = @transform_1, window_bounds = array<i64: 32, 64>}, {pipeline_mode = #tpu.pipeline_mode<synchronous>, transform_indices = @transform_2, window_bounds = array<i64: 1, 64>}, {transform_indices = @transform_3, window_bounds = array<i64: 16, 32>}, {transform_indices = @transform_4, window_bounds = array<i64: 16, 30>}, {transform_indices = @transform_5, window_bounds = array<i64: 16, 2>}, {transform_indices = @transform_6, window_bounds = array<i64: 16, 1>}]} {
    %c0 = arith.constant 0 : index
    %c0_0 = arith.constant 0 : index
    %0 = vector.load %arg1[%c0, %c0_0] : memref<16x32xf32, #tpu.memory_space<vmem>>, vector<16x32xf32>
    %c0_1 = arith.constant 0 : index
    %c0_2 = arith.constant 0 : index
    %1 = vector.load %arg2[%c0_1, %c0_2] : memref<32x64xf32, #tpu.memory_space<vmem>>, vector<32x64xf32>
    %cst = arith.constant dense<0.000000e+00> : vector<16x64xf32>
    %2 = tpu.matmul %0, %1, %cst {dimension_numbers = #tpu.dot_dimension_numbers<[1], [0], [0], [1], [0, 0, 1, 1], [], []>} : vector<16x32xf32>, vector<32x64xf32>, vector<16x64xf32> -> vector<16x64xf32>
    %c0_3 = arith.constant 0 : index
    %c0_4 = arith.constant 0 : index
    %3 = vector.load %arg3[%c0_3, %c0_4] : memref<1x64xf32, #tpu.memory_space<vmem>>, vector<1x64xf32>
    %4 = vector.broadcast %3 : vector<1x64xf32> to vector<16x64xf32>
    %5 = arith.addf %2, %4 : vector<16x64xf32>
    %6 = vector.extract_strided_slice %5 {offsets = [0, 0], sizes = [16, 32], strides = [1, 1]} : vector<16x64xf32> to vector<16x32xf32>
    %c0_5 = arith.constant 0 : index
    %c0_6 = arith.constant 0 : index
    %7 = vector.load %arg4[%c0_5, %c0_6] : memref<16x32xf32, #tpu.memory_space<vmem>>, vector<16x32xf32>
    tpu.vector_store %arg4[%c0_5, %c0_6], %6 {strides = array<i32>} : memref<16x32xf32, #tpu.memory_space<vmem>>, vector<16x32xf32>,
    %8 = vector.extract_strided_slice %5 {offsets = [0, 32], sizes = [16, 30], strides = [1, 1]} : vector<16x64xf32> to vector<16x30xf32>
    %c0_7 = arith.constant 0 : index
    %c0_8 = arith.constant 0 : index
    %9 = vector.load %arg5[%c0_7, %c0_8] : memref<16x30xf32, #tpu.memory_space<vmem>>, vector<16x30xf32>
    tpu.vector_store %arg5[%c0_7, %c0_8], %8 {strides = array<i32>} : memref<16x30xf32, #tpu.memory_space<vmem>>, vector<16x30xf32>,
    %10 = vector.extract_strided_slice %5 {offsets = [0, 32], sizes = [16, 32], strides = [1, 1]} : vector<16x64xf32> to vector<16x32xf32>
    %11 = tpu.transpose %10, [1, 0] : vector<16x32xf32> -> vector<32x16xf32>
    %12 = vector.extract_strided_slice %11 {offsets = [0, 0], sizes = [5, 16], strides = [1, 1]} : vector<32x16xf32> to vector<5x16xf32>
    %13 = vector.extract_strided_slice %11 {offsets = [5, 0], sizes = [5, 16], strides = [1, 1]} : vector<32x16xf32> to vector<5x16xf32>
    %14 = vector.extract_strided_slice %11 {offsets = [10, 0], sizes = [5, 16], strides = [1, 1]} : vector<32x16xf32> to vector<5x16xf32>
    %15 = vector.extract_strided_slice %11 {offsets = [15, 0], sizes = [5, 16], strides = [1, 1]} : vector<32x16xf32> to vector<5x16xf32>
    %cst_9 = arith.constant 0.000000e+00 : f32
    %16 = vector.broadcast %cst_9 : f32 to vector<5x16xf32>
    %17 = arith.subf %16, %15 : vector<5x16xf32>
    %18 = math.exp %17 : vector<5x16xf32>
    %19 = vector.extract_strided_slice %11 {offsets = [20, 0], sizes = [5, 16], strides = [1, 1]} : vector<32x16xf32> to vector<5x16xf32>
    %cst_10 = arith.constant 0.000000e+00 : f32
    %20 = vector.broadcast %cst_10 : f32 to vector<5x16xf32>
    %21 = arith.subf %20, %19 : vector<5x16xf32>
    %22 = math.exp %21 : vector<5x16xf32>
    %23 = vector.extract_strided_slice %11 {offsets = [25, 0], sizes = [5, 16], strides = [1, 1]} : vector<32x16xf32> to vector<5x16xf32>
    %24 = math.tanh %23 : vector<5x16xf32>
    %cst_11 = arith.constant -0.949999988 : f32
    %cst_12 = arith.constant 0.949999988 : f32
    %25 = vector.broadcast %cst_11 : f32 to vector<5x16xf32>
    %26 = arith.maximumf %25, %24 : vector<5x16xf32>
    %27 = vector.broadcast %cst_12 : f32 to vector<5x16xf32>
    %28 = arith.minimumf %27, %26 : vector<5x16xf32>
    %cst_13 = arith.constant dense<0xFF800000> : vector<16xf32>
    %29 = vector.multi_reduction <maximumf>, %12, %cst_13 [0] : vector<5x16xf32> to vector<16xf32>
    %30 = vector.shape_cast %29 : vector<16xf32> to vector<1x16xf32>
    %31 = vector.broadcast %30 : vector<1x16xf32> to vector<5x16xf32>
    %32 = arith.subf %12, %31 : vector<5x16xf32>
    %33 = math.exp %32 : vector<5x16xf32>
    %cst_14 = arith.constant dense<0.000000e+00> : vector<16xf32>
    %34 = vector.multi_reduction <add>, %33, %cst_14 [0] : vector<5x16xf32> to vector<16xf32>
    %35 = vector.shape_cast %34 : vector<16xf32> to vector<1x16xf32>
    %36 = tpu.reciprocal %35 {approx = true} : vector<1x16xf32> -> vector<1x16xf32>
    %37 = vector.broadcast %36 : vector<1x16xf32> to vector<5x16xf32>
    %38 = arith.mulf %33, %37 : vector<5x16xf32>
    %39 = tpu.iota {dimensions = array<i32: 0>} : vector<5x16xi32>
    %40 = vector.broadcast %30 : vector<1x16xf32> to vector<5x16xf32>
    %41 = arith.cmpf oge, %12, %40 : vector<5x16xf32>
    %c5_i32 = arith.constant 5 : i32
    %42 = vector.broadcast %c5_i32 : i32 to vector<5x16xi32>
    %43 = arith.select %41, %39, %42 : vector<5x16xi1>, vector<5x16xi32>
    %cst_15 = arith.constant dense<2147483647> : vector<16xi32>
    %44 = vector.multi_reduction <minsi>, %43, %cst_15 [0] : vector<5x16xi32> to vector<16xi32>
    %45 = vector.shape_cast %44 : vector<16xi32> to vector<1x16xi32>
    %46 = vector.broadcast %45 : vector<1x16xi32> to vector<5x16xi32>
    %47 = arith.cmpi eq, %39, %46 : vector<5x16xi32>
    %48 = arith.extui %47 : vector<5x16xi1> to vector<5x16xi32>
    %49 = arith.sitofp %48 : vector<5x16xi32> to vector<5x16xf32>
    %50 = arith.mulf %13, %49 : vector<5x16xf32>
    %cst_16 = arith.constant dense<0.000000e+00> : vector<16xf32>
    %51 = vector.multi_reduction <add>, %50, %cst_16 [0] : vector<5x16xf32> to vector<16xf32>
    %52 = vector.shape_cast %51 : vector<16xf32> to vector<1x16xf32>
    %53 = arith.mulf %14, %49 : vector<5x16xf32>
    %cst_17 = arith.constant dense<0.000000e+00> : vector<16xf32>
    %54 = vector.multi_reduction <add>, %53, %cst_17 [0] : vector<5x16xf32> to vector<16xf32>
    %55 = vector.shape_cast %54 : vector<16xf32> to vector<1x16xf32>
    %56 = vector.broadcast %52 : vector<1x16xf32> to vector<5x16xf32>
    %57 = arith.subf %56, %13 : vector<5x16xf32>
    %58 = arith.mulf %57, %18 : vector<5x16xf32>
    %59 = vector.broadcast %55 : vector<1x16xf32> to vector<5x16xf32>
    %60 = arith.subf %59, %14 : vector<5x16xf32>
    %61 = arith.mulf %60, %22 : vector<5x16xf32>
    %62 = arith.mulf %58, %58 : vector<5x16xf32>
    %63 = arith.mulf %61, %61 : vector<5x16xf32>
    %64 = arith.addf %62, %63 : vector<5x16xf32>
    %cst_18 = arith.constant 2.000000e+00 : f32
    %65 = vector.broadcast %cst_18 : f32 to vector<5x16xf32>
    %66 = arith.mulf %65, %28 : vector<5x16xf32>
    %67 = arith.mulf %58, %61 : vector<5x16xf32>
    %68 = arith.mulf %66, %67 : vector<5x16xf32>
    %69 = arith.subf %64, %68 : vector<5x16xf32>
    %70 = arith.mulf %28, %28 : vector<5x16xf32>
    %cst_19 = arith.constant 1.000000e+00 : f32
    %71 = vector.broadcast %cst_19 : f32 to vector<5x16xf32>
    %72 = arith.subf %71, %70 : vector<5x16xf32>
    %73 = math.rsqrt %72 : vector<5x16xf32>
    %cst_20 = arith.constant 0.000000e+00 : f32
    %74 = vector.broadcast %cst_20 : f32 to vector<5x16xf32>
    %75 = arith.subf %74, %69 : vector<5x16xf32>
    %76 = arith.mulf %73, %73 : vector<5x16xf32>
    %cst_21 = arith.constant 5.000000e-01 : f32
    %77 = vector.broadcast %cst_21 : f32 to vector<5x16xf32>
    %78 = arith.mulf %77, %76 : vector<5x16xf32>
    %79 = arith.mulf %75, %78 : vector<5x16xf32>
    %cst_22 = arith.constant 0.159154937 : f32
    %80 = vector.broadcast %cst_22 : f32 to vector<5x16xf32>
    %81 = arith.mulf %80, %18 : vector<5x16xf32>
    %82 = arith.mulf %81, %22 : vector<5x16xf32>
    %83 = arith.mulf %82, %73 : vector<5x16xf32>
    %cst_23 = arith.constant 1.000000e+05 : f32
    %84 = vector.broadcast %cst_23 : f32 to vector<5x16xf32>
    %85 = arith.minimumf %83, %84 : vector<5x16xf32>
    %86 = math.exp %79 : vector<5x16xf32>
    %87 = arith.mulf %38, %86 : vector<5x16xf32>
    %88 = arith.mulf %87, %85 : vector<5x16xf32>
    %cst_24 = arith.constant dense<0.000000e+00> : vector<16xf32>
    %89 = vector.multi_reduction <add>, %88, %cst_24 [0] : vector<5x16xf32> to vector<16xf32>
    %90 = vector.shape_cast %89 : vector<16xf32> to vector<1x16xf32>
    %cst_25 = arith.constant 0.000000e+00 : f32
    %91 = vector.broadcast %cst_25 : f32 to vector<5x16xf32>
    %92 = tpu.concatenate %52, %55, %90, %91 in 0 : vector<1x16xf32>, vector<1x16xf32>, vector<1x16xf32>, vector<5x16xf32> -> vector<8x16xf32>
    %93 = tpu.transpose %92, [1, 0] : vector<8x16xf32> -> vector<16x8xf32>
    %94 = vector.extract_strided_slice %93 {offsets = [0, 0], sizes = [16, 2], strides = [1, 1]} : vector<16x8xf32> to vector<16x2xf32>
    %c0_26 = arith.constant 0 : index
    %c0_27 = arith.constant 0 : index
    %95 = vector.load %arg6[%c0_26, %c0_27] : memref<16x2xf32, #tpu.memory_space<vmem>>, vector<16x2xf32>
    tpu.vector_store %arg6[%c0_26, %c0_27], %94 {strides = array<i32>} : memref<16x2xf32, #tpu.memory_space<vmem>>, vector<16x2xf32>,
    %96 = vector.extract_strided_slice %93 {offsets = [0, 2], sizes = [16, 1], strides = [1, 1]} : vector<16x8xf32> to vector<16x1xf32>
    %c0_28 = arith.constant 0 : index
    %c0_29 = arith.constant 0 : index
    %97 = vector.load %arg7[%c0_28, %c0_29] : memref<16x1xf32, #tpu.memory_space<vmem>>, vector<16x1xf32>
    tpu.vector_store %arg7[%c0_28, %c0_29], %96 {strides = array<i32>} : memref<16x1xf32, #tpu.memory_space<vmem>>, vector<16x1xf32>,
    return
  }
  func.func @transform_0(%arg0: i32) -> (i32, i32) {
    %c0_i32 = arith.constant 0 : i32
    %c0_i32_0 = arith.constant 0 : i32
    return %arg0, %c0_i32 : i32, i32
  }
  func.func @transform_1(%arg0: i32) -> (i32, i32) {
    %c0_i32 = arith.constant 0 : i32
    %c0_i32_0 = arith.constant 0 : i32
    %c0_i32_1 = arith.constant 0 : i32
    return %c0_i32, %c0_i32_0 : i32, i32
  }
  func.func @transform_2(%arg0: i32) -> (i32, i32) {
    %c0_i32 = arith.constant 0 : i32
    %c0_i32_0 = arith.constant 0 : i32
    %c0_i32_1 = arith.constant 0 : i32
    return %c0_i32, %c0_i32_0 : i32, i32
  }
  func.func @transform_3(%arg0: i32) -> (i32, i32) {
    %c0_i32 = arith.constant 0 : i32
    %c0_i32_0 = arith.constant 0 : i32
    return %arg0, %c0_i32 : i32, i32
  }
  func.func @transform_4(%arg0: i32) -> (i32, i32) {
    %c0_i32 = arith.constant 0 : i32
    %c0_i32_0 = arith.constant 0 : i32
    return %arg0, %c0_i32 : i32, i32
  }
  func.func @transform_5(%arg0: i32) -> (i32, i32) {
    %c0_i32 = arith.constant 0 : i32
    %c0_i32_0 = arith.constant 0 : i32
    return %arg0, %c0_i32 : i32, i32
  }
  func.func @transform_6(%arg0: i32) -> (i32, i32) {
    %c0_i32 = arith.constant 0 : i32
    %c0_i32_0 = arith.constant 0 : i32
    return %arg0, %c0_i32 : i32, i32
  }
}

</mosaic_0001>

<bundles_post_ra>
// kernel: tpu_custom_call.1
= control target key start
LH: loop header
LB: loop body
LE: loop exit
PB: predicated region body
PF: predicated region fallthrough
CT: control target
= control target key end

     0   :  { %12 = vsyncpa [#allocation3], 0  ;;  %s730_s0 = inlined_call_operand.hbm [shape: f32[16,32], index: 0, kind: input, shape index: {}]   ;;  %s731_s1 = inlined_call_operand.hbm [shape: f32[32,64], index: 1, kind: input, shape index: {}]   ;;  %s732_s2 = inlined_call_operand.vmem [shape: f32[1,64], index: 2, kind: input, shape index: {}]   ;;  %s733_s3 = inlined_call_operand.hbm [shape: f32[16,32], index: 3, kind: output, shape index: {0}]   ;;  %s734_s4 = inlined_call_operand.hbm [shape: f32[16,30], index: 4, kind: output, shape index: {1}]   ;;  %s735_s5 = inlined_call_operand.vmem [shape: f32[16,2], index: 5, kind: output, shape index: {2}]   ;;  %s736_s6 = inlined_call_operand.vmem [shape: f32[16,1], index: 6, kind: output, shape index: {3}]  }
   0x1   :  { %13 = vsyncpa [#allocation6], 0 }
   0x2   :  { %14 = vsyncpa [#allocation4], 0 }
   0x3   :  { %15 = vsyncpa [#allocation9], 0  ;;  %s597_s21 = smov [#allocation2]  }
   0x4   :  { %s21_s22 = sshll.u32 %s597_s21, 4  ;;  %s22_s22 = int_to_ptr.vmem [resolvable:$true] %s21_s22 }
   0x5   :  { %s517_s23 = scalar_lea.vmem %s22_s22, 256  ;;  %p522_p1 = scmp.lt.s32.totalorder %s22_s22, %s22_s22 }
   0x6   :  { %p518_p0 = scmp.ne.s32.totalorder %s22_s22, %s517_s23  ;;  %p523_p2 = scmp.lt.s32.totalorder %s517_s23, %s517_s23 }
   0x8   :  { %p524_p3 = por %p523_p2, %p522_p1 }
   0xa   :  { %p525_p4 = pnand %p524_p3, %p518_p0 }
   0xc   :  { %528 = shalt.err (!%p525_p4)
}
   0xd   :  { %s598_s24 = smov 128   ;;  %s599_s25 = smov 8  }
   0xe   :  { %27 = dma.hbm_to_vmem [thread:$0]  %s730_s0, 256, %s22_s22, [#allocation3], %s598_s24, %s598_s24, %s599_s25  }
   0xf   :  { %s600_s28 = smov [#allocation5]  }
  0x10   :  { %s33_s29 = sshll.u32 %s600_s28, 4  ;;  %s34_s29 = int_to_ptr.vmem [resolvable:$true] %s33_s29 }
  0x11   :  { %s537_s30 = scalar_lea.vmem %s34_s29, 512  ;;  %p542_p6 = scmp.lt.s32.totalorder %s34_s29, %s34_s29 }
  0x12   :  { %p538_p5 = scmp.ne.s32.totalorder %s34_s29, %s537_s30  ;;  %p543_p7 = scmp.lt.s32.totalorder %s537_s30, %s537_s30 }
  0x14   :  { %p544_p8 = por %p543_p7, %p542_p6 }
  0x16   :  { %p545_p9 = pnand %p544_p8, %p538_p5 }
  0x18   :  { %548 = shalt.err (!%p545_p9)
}
  0x19   :  { %39 = dma.hbm_to_vmem [thread:$0]  %s731_s1, 512, %s34_s29, [#allocation6], %s598_s24, %s598_s24, %s599_s25  }
  0x1a   :  { %589 = dma.done.wait [#allocation3], 256  }
  0x1b   :  { %590 = vsyncadd [#allocation3], 4294967040 }
  0x1c   :  { %591 = dma.done.wait [#allocation6], 512  }
  0x1d   :  { %592 = vsyncadd [#allocation6], 4294966784  ;;  %vm61_vm0 = vcmask 261120   ;;  %v53_v0 = vld [vmem:[#allocation5 + $0x18] sm:$0xff]  ;;  %v52_v1 = vld [vmem:[#allocation5 + $0x10] sm:$0xff]  ;;  %s601_s9 = smov 96   ;;  %v220_v19 = vlaneseq }
  0x1e   :  { %471 = vmatprep.subr.mxu0 %v53_v0  ;;  %v48_v2 = vld [vmem:[#allocation2] sm:$0xff]  ;;  %v51_v3 = vld [vmem:[#allocation5 + $0x8] sm:$0xff]  ;;  %v50_v4 = vld [vmem:[#allocation5] sm:$0xff]  ;;  %vm153_vm1 = vcmask 244736   ;;  %vm200_vm2 = vcmask 126976   ;;  %v602_v43 = vmov 0.0  }
  0x1f   :  { %472 = vmatpush3.msra.mxu0 %v53_v0  ;;  %479 = vmatprep.mubr.msk.f32.mxu0 %vm61_vm0, %v48_v2  ;;  %v49_v5 = vld [vmem:[#allocation2 + $0x8] sm:$0xff]  ;;  %v460_v6 = vld [vmem:[%s732_s2] ss:$0 sm:$0xff]  ;;  %v221_v23 = vshrl.u32 %v220_v19, 7  ;;  %vm244_vm8 = vcmask 1042432   ;;  %vm273_vm9 = vcmask 1045504  }
  0x20   :  { %473 = vmatprep.subr.mxu0 %v52_v1  ;;  %vm303_vm10 = vcmask 1043456   ;;  %vm355_vm11 = vcmask 1040384   ;;  %vm369_vm12 = vcmask 1041408   ;;  %s603_s2 = smov [#allocation7]   ;;  %s604_s11 = smov [#allocation8]  }
  0x21   :  { %474 = vmatpush3.msra.mxu0 %v52_v1  ;;  %s423_s10 = sshll.u32 %s603_s2, 4  ;;  %s435_s12 = sshll.u32 %s604_s11, 4  ;;  %s424_s10 = int_to_ptr.vmem [resolvable:$true] %s423_s10  ;;  %s436_s12 = int_to_ptr.vmem [resolvable:$true] %s435_s12 }
  0x22   :  { %475 = vmatprep.subr.mxu0 %v51_v3  ;;  %s549_s13 = scalar_lea.vmem %s424_s10, 256  ;;  %p554_p11 = scmp.lt.s32.totalorder %s424_s10, %s424_s10 }
  0x23   :  { %476 = vmatpush3.msra.mxu0 %v51_v3  ;;  %p550_p10 = scmp.ne.s32.totalorder %s424_s10, %s549_s13  ;;  %p555_p12 = scmp.lt.s32.totalorder %s549_s13, %s549_s13 }
  0x24   :  { %477 = vmatprep.subr.mxu0 %v50_v4 }
  0x25   :  { %478 = vmatpush3.msra.mxu0 %v50_v4  ;;  %p556_p13 = por %p555_p12, %p554_p11 }
  0x26   :  { %480 = vmatmul.mubr.msk.f32.vlgmr.msra.gmra.mxu0 %vm61_vm0, %v49_v5 }
  0x27   :  { %p557_p0 = pnand %p556_p13, %p550_p10 }
  0xe6   :  { %v481_v7 = vpop.f32.mrf.mxu0 }
  0xe7   :  { %v140_v8 = vadd.f32 %v481_v7, %v460_v6 }
  0xe8   :  { %v134_v9 = vpop.f32.mrf.mxu0 }
  0xe9   :  { %144 = vst.msk [vmem:[#allocation7 + $0x8] sm:$0xff] %vm61_vm0, %v140_v8  ;;  %v135_v10 = vadd.f32 %v460_v6, %v134_v9 }
  0xeb   :  { %143 = vst.msk [vmem:[#allocation7] sm:$0xff] %vm61_vm0, %v135_v10  ;;  %147 = vrot.lane.b32.xlu0 %v135_v10, %s601_s9 }
  0xef   :  { %149 = vrot.lane.b32.xlu0 %v140_v8, %s601_s9 }
 0x15d   :  { %v148_v11 = vpop.permute.xlu0 %147 }
 0x15e   :  { %154 = vst.msk [vmem:[#allocation8] sm:$0xff] %vm153_vm1, %v148_v11  ;;  %156 = vxpose.xlu1.b32.start [1/2] (short) (narrow) %v148_v11, 32 }
 0x161   :  { %v150_v12 = vpop.permute.xlu0 %149 }
 0x162   :  { %155 = vst.msk [vmem:[#allocation8 + $0x8] sm:$0xff] %vm153_vm1, %v150_v12  ;;  %157 = vxpose.xlu1.b32.end [2/2] (short) (narrow) %v150_v12, 32 }
 0x1da   :  { %v660_v13 = vpop.trf.xlu1 }
 0x1db   :  { %v201_v14 = vsel %vm200_vm2, %v660_v13, -inf }
 0x1dc   :  { %v202_v15 = vrot.slane %v201_v14, 4 }
 0x1de   :  { %v203_v16 = vmax.f32 %v201_v14, %v202_v15  ;;  %v664_v17 = vpop.trf.xlu1 }
 0x1df   :  { %v188_v32 = vsub.f32 0.0, %v664_v17 }
 0x1e0   :  { %v204_v18 = vrot.slane %v203_v16, 2 }
 0x1e1   :  { %v190_v38 = vmul.f32 1.442695, %v188_v32 }
 0x1e2   :  { %v205_v20 = vmax.f32 %v203_v16, %v204_v18  ;;  %v174_v21 = vpop.trf.xlu1 }
 0x1e3   :  { %v189_v35 = vsub.f32 0.0, %v174_v21 }
 0x1e4   :  { %v206_v22 = vrot.slane %v205_v20, 1 }
 0x1e5   :  { %v192_v42 = vmul.f32 1.442695, %v189_v35 }
 0x1e6   :  { %v207_v24 = vmax.f32 %v205_v20, %v206_v22  ;;  %v175_v25 = vpop.trf.xlu1 }
 0x1e7   :  { %491 = vtanh.f32 %v175_v25  ;;  %v194_v33 = vsub.f32 0.0, %v175_v25 }
 0x1e8   :  { %vm222_vm3 = vcmp.ge.f32.partialorder %v660_v13, %v207_v24  ;;  %v208_v30 = vsub.f32 %v660_v13, %v207_v24 }
 0x1e9   :  { %v223_v26 = vsel %vm222_vm3, %v221_v23, 5  ;;  %v195_v39 = vmul.f32 1.442695, %v194_v33 }
 0x1ea   :  { %v224_v27 = vsel %vm200_vm2, %v223_v26, 2147483647  ;;  %v209_v36 = vmul.f32 1.442695, %v208_v30 }
 0x1eb   :  { %v225_v28 = vrot.slane %v224_v27, 4 }
 0x1ec   :  { %493 = vpow2.f32 %v209_v36 }
 0x1ed   :  { %vm226_vm4 = vcmp.lt.s32.totalorder %v224_v27, %v225_v28  ;;  %495 = vpow2.f32 %v190_v38 }
 0x1ee   :  { %v227_v29 = vsel %vm226_vm4, %v224_v27, %v225_v28  ;;  %497 = vpow2.f32 %v195_v39 }
 0x1ef   :  { %v228_v31 = vrot.slane %v227_v29, 2  ;;  %499 = vpow2.f32 %v192_v42 }
 0x1f1   :  { %vm229_vm5 = vcmp.lt.s32.totalorder %v227_v29, %v228_v31 }
 0x1f2   :  { %v230_v34 = vsel %vm229_vm5, %v227_v29, %v228_v31 }
 0x1f3   :  { %v231_v37 = vrot.slane %v230_v34, 1 }
 0x1f4   :  { %v492_v40 = vpop.eup %491 }
 0x1f5   :  { %vm232_vm6 = vcmp.lt.s32.totalorder %v230_v34, %v231_v37  ;;  %v463_v47 = vclamps-f32 %v492_v40, 0.95 }
 0x1f6   :  { %v233_v41 = vsel %vm232_vm6, %v230_v34, %v231_v37 }
 0x1f7   :  { %vm234_vm7 = vcmp.eq.s32.totalorder %v221_v23, %v233_v41  ;;  %v314_v54 = vmul.f32 %v463_v47, %v463_v47 }
 0x1f8   :  { %v464_v44 = vsel %vm234_vm7, 1.0, %v602_v43 }
 0x1f9   :  { %v238_v45 = vrot.slane %v464_v44, 3  ;;  %v256_v46 = vrot.slane %v464_v44, 6  ;;  %v315_v59 = vsub.f32 1.0, %v314_v54  ;;  %v676_v63 = vpop.eup %493 }
 0x1fa   :  { %v496_v1 = vpop.eup %495  ;;  %v211_v6 = vsel %vm200_vm2, %v676_v63, 0.0 }
 0x1fb   :  { %v240_v48 = vmul.f32 %v238_v45, %v660_v13  ;;  %v241_v49 = vmul.f32 %v238_v45, %v664_v17  ;;  %v258_v50 = vmul.f32 %v256_v46, %v664_v17  ;;  %501 = vrsqrt.f32 %v315_v59  ;;  %v678_v3 = vpop.eup %497 }
 0x1fc   :  { %v680_v5 = vpop.eup %499  ;;  %v283_v9 = vrot.slane %v678_v3, 2  ;;  %v212_v11 = vrot.slane %v211_v6, 4  ;;  %v274_v14 = vrot.slane %v496_v1, 2 }
 0x1fd   :  { %v245_v51 = vrot.slane %v240_v48, 5  ;;  %v246_v52 = vrot.slane %v241_v49, 5  ;;  %v260_v53 = vrot.slane %v258_v50, 2  ;;  %v275_v15 = vrot.slane %v680_v5, 2 }
 0x1fe   :  { %v213_v22 = vadd.f32 %v212_v11, %v211_v6  ;;  %v327_v59 = vmul.f32 0.15915494, %v680_v5 }
 0x1ff   :  { %v262_v55 = vsel %vm200_vm2, %v260_v53, 0.0  ;;  %v247_v56 = vsel %vm244_vm8, %v245_v51, %v246_v52  ;;  %v284_v21 = vsel %vm273_vm9, %v275_v15, %v283_v9  ;;  %v276_v23 = vsel %vm273_vm9, %v274_v14, %v275_v15 }
 0x200   :  { %v263_v57 = vrot.slane %v262_v55, 4  ;;  %v249_v58 = vsel %vm200_vm2, %v247_v56, 0.0  ;;  %v214_v30 = vrot.slane %v213_v22, 2 }
 0x201   :  { %v250_v60 = vrot.slane %v249_v58, 4 }
 0x202   :  { %v264_v61 = vadd.f32 %v263_v57, %v262_v55  ;;  %v215_v38 = vadd.f32 %v214_v30, %v213_v22  ;;  %v328_v57 = vrot.slane %v680_v5, 5 }
 0x203   :  { %v251_v62 = vadd.f32 %v250_v60, %v249_v58  ;;  %v326_v58 = vmul.f32 0.15915494, %v496_v1 }
 0x204   :  { %v265_v0 = vrot.slane %v264_v61, 2  ;;  %v216_v45 = vrot.slane %v215_v38, 1 }
 0x205   :  { %v252_v2 = vrot.slane %v251_v62, 2 }
 0x206   :  { %v266_v4 = vadd.f32 %v265_v0, %v264_v61  ;;  %v217_v52 = vadd.f32 %v216_v45, %v215_v38 }
 0x207   :  { %v253_v7 = vadd.f32 %v252_v2, %v251_v62  ;;  %v333_v62 = vmul.f32 %v328_v57, %v326_v58 }
 0x208   :  { %v267_v8 = vrot.slane %v266_v4, 1  ;;  %v502_v29 = vpop.eup %501  ;;  %503 = vrcp.f32 %v217_v52 }
 0x209   :  { %v254_v10 = vrot.slane %v253_v7, 1  ;;  %v319_v33 = vmul.f32 %v502_v29, %v502_v29  ;;  %v336_v61 = vrot.slane %v502_v29, 2 }
 0x20a   :  { %v685_v12 = vadd.f32 %v267_v8, %v266_v4 }
 0x20b   :  { %v688_v16 = vadd.f32 %v254_v10, %v253_v7  ;;  %v320_v41 = vmul.f32 0.5, %v319_v33  ;;  %v338_v2 = vmul.f32 %v336_v61, %v333_v62 }
 0x20c   :  { %v281_v18 = vsub.f32 %v685_v12, %v664_v17 }
 0x20d   :  { %v269_v19 = vsub.f32 %v688_v16, %v660_v13  ;;  %v270_v20 = vsub.f32 %v688_v16, %v664_v17  ;;  %v295_v13 = vmul.f32 2.0, %v463_v47  ;;  %v322_v49 = vrot.slane %v320_v41, 4 }
 0x20e   :  { %v286_v24 = vmul.f32 %v284_v21, %v281_v18  ;;  %v329_v47 = vrot.slane %v678_v3, 5  ;;  %v340_v6 = vmin.f32 %v338_v2, 100000.0 }
 0x20f   :  { %v279_v25 = vmul.f32 %v276_v23, %v269_v19  ;;  %v280_v26 = vmul.f32 %v275_v15, %v270_v20 }
 0x210   :  { %v297_v27 = vrot.slane %v286_v24, 5  ;;  %v289_v28 = vmul.f32 %v286_v24, %v286_v24  ;;  %v330_v60 = vsel %vm244_vm8, %v328_v57, %v329_v47  ;;  %v356_v14 = vrot.slane %v340_v6, 7 }
 0x211   :  { %v287_v36 = vmul.f32 %v279_v25, %v279_v25  ;;  %v288_v37 = vmul.f32 %v280_v26, %v280_v26  ;;  %v334_v0 = vmul.f32 %v330_v60, %v327_v59 }
 0x212   :  { %v299_v31 = vmul.f32 %v297_v27, %v279_v25  ;;  %v300_v32 = vmul.f32 %v297_v27, %v280_v26  ;;  %v291_v17 = vrot.slane %v289_v28, 5  ;;  %v368_v28 = vsel %vm355_vm11, %v688_v16, %v685_v12 }
 0x213   :  { %v339_v4 = vmul.f32 %v336_v61, %v334_v0 }
 0x214   :  { %v304_v34 = vrot.slane %v299_v31, 4  ;;  %v305_v35 = vrot.slane %v300_v32, 4  ;;  %v293_v42 = vadd.f32 %v291_v17, %v287_v36  ;;  %v294_v43 = vadd.f32 %v291_v17, %v288_v37 }
 0x215   :  { %v341_v7 = vmin.f32 %v339_v4, 100000.0  ;;  %v504_v3 = vpop.eup %503 }
 0x216   :  { %v306_v39 = vsel %vm303_vm10, %v304_v34, %v305_v35  ;;  %v219_v1 = vmul.f32 %v504_v3, %v676_v63 }
 0x217   :  { %v308_v40 = vmul.f32 %v306_v39, %v295_v13  ;;  %v357_v15 = vrot.slane %v341_v7, 7 }
 0x219   :  { %v310_v44 = vrot.slane %v308_v40, 4  ;;  %v358_v19 = vsel %vm355_vm11, %v356_v14, %v357_v15 }
 0x21b   :  { %v312_v46 = vsub.f32 %v293_v42, %v310_v44  ;;  %v313_v48 = vsub.f32 %v294_v43, %v310_v44 }
 0x21d   :  { %v317_v50 = vsub.f32 0.0, %v312_v46  ;;  %v318_v51 = vsub.f32 0.0, %v313_v48 }
 0x21f   :  { %v324_v53 = vmul.f32 %v322_v49, %v317_v50  ;;  %v325_v54 = vmul.f32 %v322_v49, %v318_v51 }
 0x221   :  { %v342_v55 = vmul.f32 1.442695, %v324_v53  ;;  %v344_v56 = vmul.f32 1.442695, %v325_v54 }
 0x223   :  { %505 = vpow2.f32 %v342_v55 }
 0x224   :  { %507 = vpow2.f32 %v344_v56 }
 0x230   :  { %v506_v8 = vpop.eup %505 }
 0x231   :  { %v508_v9 = vpop.eup %507  ;;  %v348_v10 = vrot.slane %v506_v8, 5 }
 0x232   :  { %v349_v11 = vrot.slane %v508_v9, 5 }
 0x234   :  { %v350_v5 = vsel %vm244_vm8, %v348_v10, %v349_v11 }
 0x235   :  { %v352_v18 = vmul.f32 %v350_v5, %v219_v1 }
 0x237   :  { %v360_v20 = vmul.f32 %v358_v19, %v352_v18 }
 0x239   :  { %v361_v21 = vsel %vm200_vm2, %v360_v20, 0.0 }
 0x23a   :  { %v362_v22 = vrot.slane %v361_v21, 4 }
 0x23c   :  { %v363_v23 = vadd.f32 %v362_v22, %v361_v21 }
 0x23e   :  { %v364_v24 = vrot.slane %v363_v23, 2 }
 0x240   :  { %v365_v25 = vadd.f32 %v364_v24, %v363_v23 }
 0x242   :  { %v366_v26 = vrot.slane %v365_v25, 1 }
 0x244   :  { %v367_v27 = vadd.f32 %v366_v26, %v365_v25 }
 0x246   :  { %v370_v29 = vsel %vm369_vm12, %v368_v28, %v367_v27 }
 0x247   :  { %v371_v63 = vsel %vm244_vm8, %v370_v29, 0.0 }
 0x248   :  { %372 = vxpose.xlu0.b32.start.end [1/1] (short) (narrow) %v371_v63, 16 }
 0x249   :  { %560 = shalt.err (!%p557_p0)
}
 0x24a   :  { %429 = dma.vmem_to_hbm [thread:$0]  %s424_s10, 256, %s733_s3, [#allocation4], %s598_s24, %s598_s24, %s599_s25  }
 0x24b   :  { %s569_s16 = scalar_lea.vmem %s436_s12, 256  ;;  %p574_p2 = scmp.lt.s32.totalorder %s436_s12, %s436_s12 }
 0x24c   :  { %p570_p1 = scmp.ne.s32.totalorder %s436_s12, %s569_s16  ;;  %p575_p3 = scmp.lt.s32.totalorder %s569_s16, %s569_s16 }
 0x24e   :  { %p576_p4 = por %p575_p3, %p574_p2 }
 0x250   :  { %p577_p5 = pnand %p576_p4, %p570_p1 }
 0x252   :  { %580 = shalt.err (!%p577_p5)
}
 0x253   :  { %441 = dma.vmem_to_hbm [thread:$0]  %s436_s12, 256, %s734_s4, [#allocation9], %s598_s24, %s598_s24, %s599_s25   ;;  %vm404_vm13 = vcmask 15360   ;;  %vm415_vm14 = vcmask 7168  }
 0x254   :  { %s605_s3 = smov 126  }
 0x2c4   :  { %v388_v12 = vpop.trf.xlu0 }
 0x2c5   :  { %405 = vst.msk [vmem:[%s735_s5] sm:$0xff] %vm404_vm13, %v388_v12  ;;  %409 = vrot.lane.b32.xlu1 %v388_v12, %s605_s3 }
 0x2c8   :  { %v389_v16 = vpop.trf.xlu0 }
 0x2c9   :  { %406 = vst.msk [vmem:[%s735_s5 + $0x8] sm:$0xff] %vm404_vm13, %v389_v16  ;;  %411 = vrot.lane.b32.xlu0 %v389_v16, %s605_s3 }
 0x337   :  { %v410_v30 = vpop.permute.xlu1 %409 }
 0x338   :  { %416 = vst.msk [vmem:[%s736_s6] sm:$0xff] %vm415_vm14, %v410_v30 }
 0x33b   :  { %v412_v31 = vpop.permute.xlu0 %411 }
 0x33c   :  { %417 = vst.msk [vmem:[%s736_s6 + $0x8] sm:$0xff] %vm415_vm14, %v412_v31 }
 0x33d   :  { %593 = dma.done.wait [#allocation4], 256  }
 0x33e   :  { %594 = vsyncadd [#allocation4], 4294967040 }
 0x33f   :  { %595 = dma.done.wait [#allocation9], 256  }
 0x340   :  { %596 = vsyncadd [#allocation9], 4294967040 }
 0x341   :  { %456 = vsyncpa [#allocation3], 1 }
 0x342   :  { %457 = vsyncpa [#allocation6], 1 }
 0x343   :  { %458 = vsyncpa [#allocation4], 1 }
 0x344   :  { %459 = vsyncpa [#allocation9], 1 }

</bundles_post_ra>
